<compile_context>
chip_gen: v5e
topology: v5e:2x2
jax: 0.10.0
libtpu: 0.0.40
codegen_flags: <defaults>
</compile_context>

<pallas_src>
import functools
import math

import jax
import jax.numpy as jnp
from jax.experimental import pallas as pl
from jax.experimental.pallas import tpu as pltpu


def _fused_mmattn_kernel(a1_ref, a2_ref, main_ref,
                         wq_ref, bq_ref, wk_ref, bk_ref, wv_ref, bv_ref,
                         score1_ref, score2_ref, nf_ref, *, scale):
    """One fusion step for a (Bt, T, C) batch tile.

    a1 = f_2dcnn, a2 = f_audio, main = f_auspec.
    Outputs: score1 = softmax(Q1 K^T * s), score2 = softmax(Q2 K^T * s),
             nf = concat(f_2dcnn', f_audio', f_auspec) with the fused residuals.
    """
    bt, T, C = main_ref.shape
    H = wq_ref.shape[1]
    M = bt * T

    main = main_ref[...].astype(jnp.float32)              # (bt, T, C)
    main_flat = main.reshape(M, C)

    # Stacked Q projection: both branches share Wq, so fold them into one matmul
    # with M-dimension 2*bt*T (better MXU row occupancy than per-call (T, C)).
    a_flat = jnp.concatenate(
        [a1_ref[...].reshape(M, C), a2_ref[...].reshape(M, C)], axis=0)   # (2M, C)
    qq = jnp.dot(a_flat, wq_ref[...],
                 preferred_element_type=jnp.float32) + bq_ref[...]        # (2M, H)

    # K/V are computed from `main` only -> hoisted, shared by both branches.
    k = jnp.dot(main_flat, wk_ref[...],
                preferred_element_type=jnp.float32) + bk_ref[...]         # (M, H)
    v = jnp.dot(main_flat, wv_ref[...],
                preferred_element_type=jnp.float32) + bv_ref[...]         # (M, C)

    q1 = qq[:M].reshape(bt, T, H)
    q2 = qq[M:].reshape(bt, T, H)
    k = k.reshape(bt, T, H)
    v = v.reshape(bt, T, C)

    def _softmax(dots):
        m = jnp.max(dots, axis=-1, keepdims=True)
        p = jnp.exp(dots - m)
        denom = jnp.sum(p, axis=-1, keepdims=True)
        # Exact reciprocal: `attn` is an externally-checked output (1e-5 tol);
        # approx=True would only save VALU work that is already hidden here.
        return p * pl.reciprocal(denom, approx=False)

    # Branch 1 (f_2dcnn path): full attention; contraction on the last dim of both
    # operands (no materialized k.T).
    dots1 = jnp.einsum("bqd,bkd->bqk", q1, k,
                       preferred_element_type=jnp.float32) * scale        # (bt,T,T)
    attn1 = _softmax(dots1)
    out1 = jnp.einsum("bqk,bkc->bqc", attn1, v,
                      preferred_element_type=jnp.float32)                 # (bt,T,C)

    # Branch 2 (f_audio path): the reference discards attn2 @ V
    # (f_audio is overwritten by f_2dcnn + f_auspec), so only the scores are kept.
    dots2 = jnp.einsum("bqd,bkd->bqk", q2, k,
                       preferred_element_type=jnp.float32) * scale
    attn2 = _softmax(dots2)

    score1_ref[...] = attn1.astype(score1_ref.dtype)
    score2_ref[...] = attn2.astype(score2_ref.dtype)

    # Fused residuals + modality concat (matches the reference quirk:
    # f_audio' = f_2dcnn' + f_auspec, i.e. the attn2 output is unused).
    f2d = out1 + main
    fau = f2d + main
    nf_ref[...] = jnp.concatenate([f2d, fau, main], axis=-1).astype(nf_ref.dtype)


def _pick_batch_tile(B, max_bt=8):
    """Largest divisor of B that is <= max_bt while keeping >=2 grid steps when
    B >= 2 (so both v7x TensorCores get a parallel unit of work)."""
    candidates = [d for d in range(1, min(B, max_bt) + 1) if B % d == 0]
    if B >= 2:
        candidates = [d for d in candidates if B // d >= 2] or [1]
    return max(candidates)


def fused_mulmo_step(f_2dcnn, f_audio, f_auspec, params, scale):
    """One fused MulMoAttn fusion iteration -> (score1, score2, node_features)."""
    B, T, C = f_auspec.shape
    H = C // 2
    wq, bq, wk, bk, wv, bv = params

    Bt = _pick_batch_tile(B)
    grid = (B // Bt,)

    seq_spec = pl.BlockSpec((Bt, T, C), lambda b: (b, 0, 0))
    full = lambda shape: pl.BlockSpec(shape, lambda b: (0,) * len(shape))
    # NOTE: weight blocks are grid-invariant; single-buffering them
    # (pipeline_mode=pl.Buffered(1)) would save a little VMEM but is skipped
    # here to keep lowering maximally portable across jax versions.
    # NOTE: at real dims (C=300) padding C to a multiple of 128 at the wrapper
    # boundary would make all tiles lane-dense; not needed at these demo shapes.

    score1, score2, nf = pl.pallas_call(
        functools.partial(_fused_mmattn_kernel, scale=scale),
        out_shape=(
            jax.ShapeDtypeStruct((B, T, T), jnp.float32),
            jax.ShapeDtypeStruct((B, T, T), jnp.float32),
            jax.ShapeDtypeStruct((B, T, 3 * C), jnp.float32),
        ),
        grid_spec=pltpu.PrefetchScalarGridSpec(
            num_scalar_prefetch=0,
            grid=grid,
            in_specs=[
                seq_spec,                 # f_2dcnn  (assis 1)
                seq_spec,                 # f_audio  (assis 2)
                seq_spec,                 # f_auspec (main)
                full((C, H)),             # Wq^T
                full((1, H)),             # bq
                full((C, H)),             # Wk^T
                full((1, H)),             # bk
                full((C, C)),             # Wv^T
                full((1, C)),             # bv
            ],
            out_specs=(
                pl.BlockSpec((Bt, T, T), lambda b: (b, 0, 0)),
                pl.BlockSpec((Bt, T, T), lambda b: (b, 0, 0)),
                pl.BlockSpec((Bt, T, 3 * C), lambda b: (b, 0, 0)),
            ),
        ),
        compiler_params=pltpu.CompilerParams(dimension_semantics=("parallel",)),
    )(f_2dcnn, f_audio, f_auspec, wq, bq, wk, bk, wv, bv)
    return score1, score2, nf


def mdg_attention_fusion(f_2dcnn, f_audio, f_auspec, params, scale, n_attn=1):
    """Reproduces the MulMoAttn fusion loop + residuals + concat from MDG.get_rep()."""
    C = f_auspec.shape[-1]
    score1 = score2 = node_features = None
    for it in range(n_attn):
        score1, score2, node_features = fused_mulmo_step(
            f_2dcnn, f_audio, f_auspec, params, scale)
        if it + 1 < n_attn:  # feed next iteration (module hard-codes n_attn = 1)
            f_2dcnn = node_features[..., :C]
            f_audio = node_features[..., C:2 * C]
    return score1, score2, node_features


def init_mulmo_params(key, in_channels):
    """Deterministic init matching MulMoAttn.__init__ weight scales."""
    C = in_channels
    H = C // 2
    k_q, k_k, k_v = jax.random.split(key, 3)
    # PyTorch stores weights as (out, in); we keep them transposed (in, out).
    wq = jax.random.normal(k_q, (C, H), jnp.float32) * math.sqrt(2.0 / H)
    wk = jax.random.normal(k_k, (C, H), jnp.float32) * math.sqrt(2.0 / H)
    wv = jax.random.normal(k_v, (C, C), jnp.float32) * math.sqrt(2.0 / C)
    bq = jnp.zeros((1, H), jnp.float32)
    bk = jnp.zeros((1, H), jnp.float32)
    bv = jnp.zeros((1, C), jnp.float32)
    return (wq, bq, wk, bk, wv, bv)


def _fusion_ref(f_2dcnn, f_audio, f_auspec, params, scale, n_attn=1):
    """Pure-JAX reference of the same fusion loop (MulMoAttn math verbatim)."""
    wq, bq, wk, bk, wv, bv = params

    def attn_fn(assis, main):
        q = assis @ wq + bq
        k = main @ wk + bk
        v = main @ wv + bv
        dots = jnp.einsum("btd,bsd->bts", q, k) * scale
        a = jax.nn.softmax(dots, axis=-1)
        o = jnp.einsum("bts,bsc->btc", a, v)
        return a, o

    s1 = s2 = None
    for _ in range(n_attn):
        s1, f_2dcnn = attn_fn(f_2dcnn, f_auspec)
        s2, f_audio = attn_fn(f_audio, f_auspec)
        f_2dcnn = f_2dcnn + f_auspec
        f_audio = f_2dcnn + f_auspec   # matches reference (uses f_2dcnn)
    nf = jnp.concatenate((f_2dcnn, f_audio, f_auspec), axis=2)
    return s1, s2, nf


if __name__ == "__main__":
    key = jax.random.PRNGKey(0)
    B, T, G = 2, 8, 32        # small stand-ins for (batch, seq, g_dim=300)
    scale_para = -0.5         # args.scale_para
    scale = float((G // 2) ** scale_para)

    k_p, k1, k2, k3 = jax.random.split(key, 4)
    params = init_mulmo_params(k_p, G)

    # Pseudo outputs of the three SeqContext encoders (see TODO above).
    f_2dcnn = jax.random.normal(k1, (B, T, G), jnp.float32)
    f_audio = jax.random.normal(k2, (B, T, G), jnp.float32)
    f_auspec = jax.random.normal(k3, (B, T, G), jnp.float32)

    score1, score2, node_features = mdg_attention_fusion(
        f_2dcnn, f_audio, f_auspec, params, scale, n_attn=1)
    jax.block_until_ready(node_features)

    # Reference check of the fused Pallas kernel against pure JAX.
    s1_r, s2_r, nf_r = _fusion_ref(f_2dcnn, f_audio, f_auspec, params, scale, n_attn=1)
    assert score1.shape == (B, T, T) and score2.shape == (B, T, T)
    assert node_features.shape == (B, T, 3 * G)
    assert jnp.allclose(score1, s1_r, atol=1e-5, rtol=1e-5)
    assert jnp.allclose(score2, s2_r, atol=1e-5, rtol=1e-5)
    assert jnp.allclose(node_features, nf_r, atol=1e-4, rtol=1e-4)

    print("KERNEL_OK")
</pallas_src>

<mosaic_0001>
module attributes {stable_mosaic.version = 11 : i64} {
  func.func @_fused_mmattn_kernel(%arg0: i32, %arg1: memref<1x8x32xf32, #tpu.memory_space<vmem>>, %arg2: memref<1x8x32xf32, #tpu.memory_space<vmem>>, %arg3: memref<1x8x32xf32, #tpu.memory_space<vmem>>, %arg4: memref<32x16xf32, #tpu.memory_space<vmem>>, %arg5: memref<1x16xf32, #tpu.memory_space<vmem>>, %arg6: memref<32x16xf32, #tpu.memory_space<vmem>>, %arg7: memref<1x16xf32, #tpu.memory_space<vmem>>, %arg8: memref<32x32xf32, #tpu.memory_space<vmem>>, %arg9: memref<1x32xf32, #tpu.memory_space<vmem>>, %arg10: memref<1x8x8xf32, #tpu.memory_space<vmem>>, %arg11: memref<1x8x8xf32, #tpu.memory_space<vmem>>, %arg12: memref<1x8x96xf32, #tpu.memory_space<vmem>>) attributes {dimension_semantics = [#tpu.dimension_semantics<parallel>], iteration_bounds = array<i64: 2>, scalar_prefetch = 0 : i64, scratch_operands = 0 : i64, tpu.core_type = #tpu.core_type<tc>, window_params = [{transform_indices = @transform_0, window_bounds = array<i64: 1, 8, 32>}, {transform_indices = @transform_1, window_bounds = array<i64: 1, 8, 32>}, {transform_indices = @transform_2, window_bounds = array<i64: 1, 8, 32>}, {pipeline_mode = #tpu.pipeline_mode<synchronous>, transform_indices = @transform_3, window_bounds = array<i64: 32, 16>}, {pipeline_mode = #tpu.pipeline_mode<synchronous>, transform_indices = @transform_4, window_bounds = array<i64: 1, 16>}, {pipeline_mode = #tpu.pipeline_mode<synchronous>, transform_indices = @transform_5, window_bounds = array<i64: 32, 16>}, {pipeline_mode = #tpu.pipeline_mode<synchronous>, transform_indices = @transform_6, window_bounds = array<i64: 1, 16>}, {pipeline_mode = #tpu.pipeline_mode<synchronous>, transform_indices = @transform_7, window_bounds = array<i64: 32, 32>}, {pipeline_mode = #tpu.pipeline_mode<synchronous>, transform_indices = @transform_8, window_bounds = array<i64: 1, 32>}, {transform_indices = @transform_9, window_bounds = array<i64: 1, 8, 8>}, {transform_indices = @transform_10, window_bounds = array<i64: 1, 8, 8>}, {transform_indices = @transform_11, window_bounds = array<i64: 1, 8, 96>}]} {
    %c0 = arith.constant 0 : index
    %c0_0 = arith.constant 0 : index
    %c0_1 = arith.constant 0 : index
    %0 = vector.load %arg3[%c0, %c0_0, %c0_1] : memref<1x8x32xf32, #tpu.memory_space<vmem>>, vector<1x8x32xf32>
    %1 = vector.shape_cast %0 : vector<1x8x32xf32> to vector<8x32xf32>
    %c0_2 = arith.constant 0 : index
    %c0_3 = arith.constant 0 : index
    %c0_4 = arith.constant 0 : index
    %2 = vector.load %arg1[%c0_2, %c0_3, %c0_4] : memref<1x8x32xf32, #tpu.memory_space<vmem>>, vector<1x8x32xf32>
    %3 = vector.shape_cast %2 : vector<1x8x32xf32> to vector<8x32xf32>
    %c0_5 = arith.constant 0 : index
    %c0_6 = arith.constant 0 : index
    %c0_7 = arith.constant 0 : index
    %4 = vector.load %arg2[%c0_5, %c0_6, %c0_7] : memref<1x8x32xf32, #tpu.memory_space<vmem>>, vector<1x8x32xf32>
    %5 = vector.shape_cast %4 : vector<1x8x32xf32> to vector<8x32xf32>
    %6 = tpu.concatenate %3, %5 in 0 : vector<8x32xf32>, vector<8x32xf32> -> vector<16x32xf32>
    %c0_8 = arith.constant 0 : index
    %c0_9 = arith.constant 0 : index
    %7 = vector.load %arg4[%c0_8, %c0_9] : memref<32x16xf32, #tpu.memory_space<vmem>>, vector<32x16xf32>
    %cst = arith.constant dense<0.000000e+00> : vector<16x16xf32>
    %8 = tpu.matmul %6, %7, %cst {dimension_numbers = #tpu.dot_dimension_numbers<[1], [0], [0], [1], [0, 0, 1, 1], [], []>} : vector<16x32xf32>, vector<32x16xf32>, vector<16x16xf32> -> vector<16x16xf32>
    %c0_10 = arith.constant 0 : index
    %c0_11 = arith.constant 0 : index
    %9 = vector.load %arg5[%c0_10, %c0_11] : memref<1x16xf32, #tpu.memory_space<vmem>>, vector<1x16xf32>
    %10 = vector.broadcast %9 : vector<1x16xf32> to vector<16x16xf32>
    %11 = arith.addf %8, %10 : vector<16x16xf32>
    %c0_12 = arith.constant 0 : index
    %c0_13 = arith.constant 0 : index
    %12 = vector.load %arg6[%c0_12, %c0_13] : memref<32x16xf32, #tpu.memory_space<vmem>>, vector<32x16xf32>
    %cst_14 = arith.constant dense<0.000000e+00> : vector<8x16xf32>
    %13 = tpu.matmul %1, %12, %cst_14 {dimension_numbers = #tpu.dot_dimension_numbers<[1], [0], [0], [1], [0, 0, 1, 1], [], []>} : vector<8x32xf32>, vector<32x16xf32>, vector<8x16xf32> -> vector<8x16xf32>
    %c0_15 = arith.constant 0 : index
    %c0_16 = arith.constant 0 : index
    %14 = vector.load %arg7[%c0_15, %c0_16] : memref<1x16xf32, #tpu.memory_space<vmem>>, vector<1x16xf32>
    %15 = vector.broadcast %14 : vector<1x16xf32> to vector<8x16xf32>
    %16 = arith.addf %13, %15 : vector<8x16xf32>
    %c0_17 = arith.constant 0 : index
    %c0_18 = arith.constant 0 : index
    %17 = vector.load %arg8[%c0_17, %c0_18] : memref<32x32xf32, #tpu.memory_space<vmem>>, vector<32x32xf32>
    %cst_19 = arith.constant dense<0.000000e+00> : vector<8x32xf32>
    %18 = tpu.matmul %1, %17, %cst_19 {dimension_numbers = #tpu.dot_dimension_numbers<[1], [0], [0], [1], [0, 0, 1, 1], [], []>} : vector<8x32xf32>, vector<32x32xf32>, vector<8x32xf32> -> vector<8x32xf32>
    %c0_20 = arith.constant 0 : index
    %c0_21 = arith.constant 0 : index
    %19 = vector.load %arg9[%c0_20, %c0_21] : memref<1x32xf32, #tpu.memory_space<vmem>>, vector<1x32xf32>
    %20 = vector.broadcast %19 : vector<1x32xf32> to vector<8x32xf32>
    %21 = arith.addf %18, %20 : vector<8x32xf32>
    %22 = vector.extract_strided_slice %11 {offsets = [0, 0], sizes = [8, 16], strides = [1, 1]} : vector<16x16xf32> to vector<8x16xf32>
    %23 = vector.shape_cast %22 : vector<8x16xf32> to vector<1x8x16xf32>
    %24 = vector.extract_strided_slice %11 {offsets = [8, 0], sizes = [8, 16], strides = [1, 1]} : vector<16x16xf32> to vector<8x16xf32>
    %25 = vector.shape_cast %24 : vector<8x16xf32> to vector<1x8x16xf32>
    %26 = vector.shape_cast %16 : vector<8x16xf32> to vector<1x8x16xf32>
    %27 = vector.shape_cast %21 : vector<8x32xf32> to vector<1x8x32xf32>
    "tpu.trace_start"() <{level = 10 : i32, message = "bqd,bkd->bqk"}> : () -> ()
    %cst_22 = arith.constant dense<0.000000e+00> : vector<1x8x8xf32>
    %28 = tpu.matmul %23, %26, %cst_22 {dimension_numbers = #tpu.dot_dimension_numbers<[2], [2], [1], [1], [0, 0, 0, 1, 1, 1], [0], [0]>} : vector<1x8x16xf32>, vector<1x8x16xf32>, vector<1x8x8xf32> -> vector<1x8x8xf32>
    "tpu.trace_stop"() : () -> ()
    %cst_23 = arith.constant 2.500000e-01 : f32
    %29 = vector.broadcast %cst_23 : f32 to vector<1x8x8xf32>
    %30 = arith.mulf %28, %29 : vector<1x8x8xf32>
    %cst_24 = arith.constant dense<0xFF800000> : vector<1x8xf32>
    %31 = vector.multi_reduction <maximumf>, %30, %cst_24 [2] : vector<1x8x8xf32> to vector<1x8xf32>
    %32 = vector.shape_cast %31 : vector<1x8xf32> to vector<1x8x1xf32>
    %33 = vector.broadcast %32 : vector<1x8x1xf32> to vector<1x8x8xf32>
    %34 = arith.subf %30, %33 : vector<1x8x8xf32>
    %35 = math.exp %34 : vector<1x8x8xf32>
    %cst_25 = arith.constant dense<0.000000e+00> : vector<1x8xf32>
    %36 = vector.multi_reduction <add>, %35, %cst_25 [2] : vector<1x8x8xf32> to vector<1x8xf32>
    %37 = vector.shape_cast %36 : vector<1x8xf32> to vector<1x8x1xf32>
    %38 = tpu.reciprocal %37 : vector<1x8x1xf32> -> vector<1x8x1xf32>
    %39 = vector.broadcast %38 : vector<1x8x1xf32> to vector<1x8x8xf32>
    %40 = arith.mulf %35, %39 : vector<1x8x8xf32>
    "tpu.trace_start"() <{level = 10 : i32, message = "bqk,bkc->bqc"}> : () -> ()
    %cst_26 = arith.constant dense<0.000000e+00> : vector<1x8x32xf32>
    %41 = tpu.matmul %40, %27, %cst_26 {dimension_numbers = #tpu.dot_dimension_numbers<[2], [1], [1], [2], [0, 0, 0, 1, 1, 2], [0], [0]>} : vector<1x8x8xf32>, vector<1x8x32xf32>, vector<1x8x32xf32> -> vector<1x8x32xf32>
    "tpu.trace_stop"() : () -> ()
    "tpu.trace_start"() <{level = 10 : i32, message = "bqd,bkd->bqk"}> : () -> ()
    %cst_27 = arith.constant dense<0.000000e+00> : vector<1x8x8xf32>
    %42 = tpu.matmul %25, %26, %cst_27 {dimension_numbers = #tpu.dot_dimension_numbers<[2], [2], [1], [1], [0, 0, 0, 1, 1, 1], [0], [0]>} : vector<1x8x16xf32>, vector<1x8x16xf32>, vector<1x8x8xf32> -> vector<1x8x8xf32>
    "tpu.trace_stop"() : () -> ()
    %cst_28 = arith.constant 2.500000e-01 : f32
    %43 = vector.broadcast %cst_28 : f32 to vector<1x8x8xf32>
    %44 = arith.mulf %42, %43 : vector<1x8x8xf32>
    %cst_29 = arith.constant dense<0xFF800000> : vector<1x8xf32>
    %45 = vector.multi_reduction <maximumf>, %44, %cst_29 [2] : vector<1x8x8xf32> to vector<1x8xf32>
    %46 = vector.shape_cast %45 : vector<1x8xf32> to vector<1x8x1xf32>
    %47 = vector.broadcast %46 : vector<1x8x1xf32> to vector<1x8x8xf32>
    %48 = arith.subf %44, %47 : vector<1x8x8xf32>
    %49 = math.exp %48 : vector<1x8x8xf32>
    %cst_30 = arith.constant dense<0.000000e+00> : vector<1x8xf32>
    %50 = vector.multi_reduction <add>, %49, %cst_30 [2] : vector<1x8x8xf32> to vector<1x8xf32>
    %51 = vector.shape_cast %50 : vector<1x8xf32> to vector<1x8x1xf32>
    %52 = tpu.reciprocal %51 : vector<1x8x1xf32> -> vector<1x8x1xf32>
    %53 = vector.broadcast %52 : vector<1x8x1xf32> to vector<1x8x8xf32>
    %54 = arith.mulf %49, %53 : vector<1x8x8xf32>
    %c0_31 = arith.constant 0 : index
    %c0_32 = arith.constant 0 : index
    %c0_33 = arith.constant 0 : index
    %55 = vector.load %arg10[%c0_31, %c0_32, %c0_33] : memref<1x8x8xf32, #tpu.memory_space<vmem>>, vector<1x8x8xf32>
    tpu.vector_store %arg10[%c0_31, %c0_32, %c0_33], %40 {strides = array<i32>} : memref<1x8x8xf32, #tpu.memory_space<vmem>>, vector<1x8x8xf32>,
    %c0_34 = arith.constant 0 : index
    %c0_35 = arith.constant 0 : index
    %c0_36 = arith.constant 0 : index
    %56 = vector.load %arg11[%c0_34, %c0_35, %c0_36] : memref<1x8x8xf32, #tpu.memory_space<vmem>>, vector<1x8x8xf32>
    tpu.vector_store %arg11[%c0_34, %c0_35, %c0_36], %54 {strides = array<i32>} : memref<1x8x8xf32, #tpu.memory_space<vmem>>, vector<1x8x8xf32>,
    %57 = arith.addf %41, %0 : vector<1x8x32xf32>
    %58 = arith.addf %57, %0 : vector<1x8x32xf32>
    %59 = tpu.concatenate %57, %58, %0 in 2 : vector<1x8x32xf32>, vector<1x8x32xf32>, vector<1x8x32xf32> -> vector<1x8x96xf32>
    %c0_37 = arith.constant 0 : index
    %c0_38 = arith.constant 0 : index
    %c0_39 = arith.constant 0 : index
    %60 = vector.load %arg12[%c0_37, %c0_38, %c0_39] : memref<1x8x96xf32, #tpu.memory_space<vmem>>, vector<1x8x96xf32>
    tpu.vector_store %arg12[%c0_37, %c0_38, %c0_39], %59 {strides = array<i32>} : memref<1x8x96xf32, #tpu.memory_space<vmem>>, vector<1x8x96xf32>,
    return
  }
  func.func @transform_0(%arg0: i32) -> (i32, i32, i32) {
    %c0_i32 = arith.constant 0 : i32
    %c0_i32_0 = arith.constant 0 : i32
    %c0_i32_1 = arith.constant 0 : i32
    return %arg0, %c0_i32, %c0_i32_0 : i32, i32, i32
  }
  func.func @transform_1(%arg0: i32) -> (i32, i32, i32) {
    %c0_i32 = arith.constant 0 : i32
    %c0_i32_0 = arith.constant 0 : i32
    %c0_i32_1 = arith.constant 0 : i32
    return %arg0, %c0_i32, %c0_i32_0 : i32, i32, i32
  }
  func.func @transform_2(%arg0: i32) -> (i32, i32, i32) {
    %c0_i32 = arith.constant 0 : i32
    %c0_i32_0 = arith.constant 0 : i32
    %c0_i32_1 = arith.constant 0 : i32
    return %arg0, %c0_i32, %c0_i32_0 : i32, i32, i32
  }
  func.func @transform_3(%arg0: i32) -> (i32, i32) {
    %c0_i32 = arith.constant 0 : i32
    %c0_i32_0 = arith.constant 0 : i32
    %c0_i32_1 = arith.constant 0 : i32
    return %c0_i32, %c0_i32_0 : i32, i32
  }
  func.func @transform_4(%arg0: i32) -> (i32, i32) {
    %c0_i32 = arith.constant 0 : i32
    %c0_i32_0 = arith.constant 0 : i32
    %c0_i32_1 = arith.constant 0 : i32
    return %c0_i32, %c0_i32_0 : i32, i32
  }
  func.func @transform_5(%arg0: i32) -> (i32, i32) {
    %c0_i32 = arith.constant 0 : i32
    %c0_i32_0 = arith.constant 0 : i32
    %c0_i32_1 = arith.constant 0 : i32
    return %c0_i32, %c0_i32_0 : i32, i32
  }
  func.func @transform_6(%arg0: i32) -> (i32, i32) {
    %c0_i32 = arith.constant 0 : i32
    %c0_i32_0 = arith.constant 0 : i32
    %c0_i32_1 = arith.constant 0 : i32
    return %c0_i32, %c0_i32_0 : i32, i32
  }
  func.func @transform_7(%arg0: i32) -> (i32, i32) {
    %c0_i32 = arith.constant 0 : i32
    %c0_i32_0 = arith.constant 0 : i32
    %c0_i32_1 = arith.constant 0 : i32
    return %c0_i32, %c0_i32_0 : i32, i32
  }
  func.func @transform_8(%arg0: i32) -> (i32, i32) {
    %c0_i32 = arith.constant 0 : i32
    %c0_i32_0 = arith.constant 0 : i32
    %c0_i32_1 = arith.constant 0 : i32
    return %c0_i32, %c0_i32_0 : i32, i32
  }
  func.func @transform_9(%arg0: i32) -> (i32, i32, i32) {
    %c0_i32 = arith.constant 0 : i32
    %c0_i32_0 = arith.constant 0 : i32
    %c0_i32_1 = arith.constant 0 : i32
    return %arg0, %c0_i32, %c0_i32_0 : i32, i32, i32
  }
  func.func @transform_10(%arg0: i32) -> (i32, i32, i32) {
    %c0_i32 = arith.constant 0 : i32
    %c0_i32_0 = arith.constant 0 : i32
    %c0_i32_1 = arith.constant 0 : i32
    return %arg0, %c0_i32, %c0_i32_0 : i32, i32, i32
  }
  func.func @transform_11(%arg0: i32) -> (i32, i32, i32) {
    %c0_i32 = arith.constant 0 : i32
    %c0_i32_0 = arith.constant 0 : i32
    %c0_i32_1 = arith.constant 0 : i32
    return %arg0, %c0_i32, %c0_i32_0 : i32, i32, i32
  }
}

</mosaic_0001>

<bundles_post_ra>
// kernel: tpu_custom_call.1
= control target key start
LH: loop header
LB: loop body
LE: loop exit
PB: predicated region body
PF: predicated region fallthrough
CT: control target
= control target key end

     0   :  { %s1356_s0 = inlined_call_operand.vmem [shape: f32[2,8,32], index: 0, kind: input, shape index: {}]   ;;  %s1357_s1 = inlined_call_operand.vmem [shape: f32[2,8,32], index: 1, kind: input, shape index: {}]   ;;  %s1358_s2 = inlined_call_operand.vmem [shape: f32[2,8,32], index: 2, kind: input, shape index: {}]   ;;  %s1359_s3 = inlined_call_operand.vmem [shape: f32[32,16], index: 3, kind: input, shape index: {}]   ;;  %s1360_s4 = inlined_call_operand.vmem [shape: f32[1,16], index: 4, kind: input, shape index: {}]   ;;  %s1361_s5 = inlined_call_operand.vmem [shape: f32[32,16], index: 5, kind: input, shape index: {}]   ;;  %s1362_s6 = inlined_call_operand.vmem [shape: f32[1,16], index: 6, kind: input, shape index: {}]   ;;  %s1363_s7 = inlined_call_operand.vmem [shape: f32[32,32], index: 7, kind: input, shape index: {}]   ;;  %s1364_s8 = inlined_call_operand.vmem [shape: f32[1,32], index: 8, kind: input, shape index: {}]   ;;  %s1365_s9 = inlined_call_operand.hbm [shape: f32[2,8,8], index: 9, kind: output, shape index: {0}]   ;;  %s1366_s10 = inlined_call_operand.hbm [shape: f32[2,8,8], index: 10, kind: output, shape index: {1}]   ;;  %s1367_s11 = inlined_call_operand.hbm [shape: f32[2,8,96], index: 11, kind: output, shape index: {2}]  }
   0x1   :  { %1372 = sst [smem:[#allocation11_spill]] %s1356_s0 }
   0x2   :  { %1373 = sst [smem:[#allocation12_spill]] %s1357_s1 }
   0x3   :  { %1374 = sst [smem:[#allocation13_spill]] %s1358_s2 }
   0x4   :  { %17 = vsyncpa [#allocation3], 0 }
   0x5   :  { %19 = vsyncpa [#allocation3 + $0x1], 0 }
   0x6   :  { %20 = vsyncpa [#allocation5], 0 }
   0x7   :  { %22 = vsyncpa [#allocation5 + $0x1], 0  ;;  %s1148_s17 = smov 0   ;;  %s1150_s18 = smov 0  }
   0x8   :  { %s1152_s19 = smov 0   ;;  %s1154_s20 = smov 0  }
   0x9 LB: > { %1375 = sst [smem:[#allocation9_spill]] %s1080_s19  ;;  %s1169_s21 = sadd.s32 4294967295, %s1084_s20   ;;  %s1084_s20 = sphi %s1154_s20, %s1389_s20   ;;  %s1080_s19 = sphi %s1152_s19, %s1386_s19   ;;  %s1076_s18 = sphi %s1150_s18, %s1388_s18   ;;  %s1072_s17 = sphi %s1148_s17, %s1387_s17  }
   0xa   : > { %s1368_s22 = sadd.s32 4294967294, %s1084_s20   ;;  %s1173_s23 = sadd.s32 1, %s1084_s20  }
   0xb   : > { %s239_s24 = sadd.s32 1, %s1080_s19  ;;  %s236_s25 = ssub.s32 %s1084_s20, %s1173_s23 }
   0xc   : > { %p249_p0 = scmp.ne.s32.totalorder %s1080_s19, %s1076_s18  ;;  %p237_p1 = scmp.eq.s32.totalorder %s236_s25, 0 }
   0xd   : > { %p250_p2 = scmp.eq.s32.totalorder %s1169_s21, 1  ;;  %p255_p3 = scmp.ne.s32.totalorder %s1076_s18, %s1072_s17 }
   0xe   : > { %p256_p4 = scmp.eq.s32.totalorder %s1368_s22, 1  ;;  %p876_p7 = scmp.ge.s32.totalorder %s1084_s20, 1 }
   0xf   : > { %s1186_s26 = scalar_select %p237_p1, %s1080_s19, %s239_s24  }
  0x10   : > { %p1188_p5 = por %p250_p2, %p249_p0  ;;  %p1192_p6 = por %p256_p4, %p255_p3 }
  0x11   : > { %1376 = sst [smem:[#allocation10_spill]] %s1186_s26  ;;  %p365_p8 = scmp.lt.s32.totalorder %s1084_s20, 3 }
  0x13   : > { %p366_p9 = pnand %p876_p7, %p365_p8 }
  0x14   : > { %p422_p10 = scmp.lt.s32.totalorder (!%p366_p9), %s1169_s21, 1  ;;  %s1379_s2 = sld [smem:[#allocation13_spill]] (!%p366_p9) }
  0x15   : > { %369 = sbr.rel (%p366_p9) target bundleno = 796 (0x31c), region = 56  ;;  %s1380_s0 = sld [smem:[#allocation11_spill]] (!%p366_p9) }
  0x16   : > { %s1381_s1 = sld [smem:[#allocation12_spill]] (!%p366_p9)  ;;  %s1370_s16 = sand.u32 (!%p366_p9), 1, %s1076_s18  }
  0x17   : > { %s1269_s24 = sshll.u32 (!%p366_p9), %s1370_s16, 3  ;;  %s1279_s22 = sshll.u32 (!%p366_p9), %s1169_s21, 3 }
  0x18   : > { %s708_s19 = scalar_lea.hbm (!%p366_p9), %s1366_s10, %s1279_s22  ;;  %s678_s26 = sand.u32 (!%p366_p9), 1, %s1169_s21  }
  0x19   : > { %s712_s13 = sshll.u32 (!%p366_p9), %s708_s19, 4  ;;  %s1286_s14 = scalar_lea.sflag (!%p366_p9), [#allocation5], %s678_s26  ;;  %s713_s13 = int_to_ptr.hbm [resolvable:$true] %s712_s13 }
  0x1a   : > { %v478_v0 = vld [vmem:[%s1361_s5 + $0x18] sm:$0xff]  ;;  %v477_v1 = vld [vmem:[%s1361_s5 + $0x10] sm:$0xff]  ;;  %v476_v4 = vld [vmem:[%s1361_s5 + $0x8] sm:$0xff]  ;;  %s423_s12 = scalar_select %p422_p10, %s1169_s21, 1  ;;  %vm445_vm0 = vcmask 261120   ;;  %vm534_vm1 = vcmask 130048  }
  0x1b   : > { %v440_v2 = vld [vmem:[%s1359_s3 + $0x18] sm:$0xff]  ;;  %498 = vmatpush.msra.mxu1 %v478_v0  ;;  %v439_v3 = vld [vmem:[%s1359_s3 + $0x10] sm:$0xff]  ;;  %v438_v5 = vld [vmem:[%s1359_s3 + $0x8] sm:$0xff]  ;;  %vm562_vm2 = vcmask 64512   ;;  %s976_s16 = sshra.s32 %s713_s13, 4  ;;  %s977_s16 = int_to_ptr.hbm [resolvable:$true] %s976_s16 }
  0x1c   : > { %464 = vmatpush.msra.mxu0 %v440_v2  ;;  %v475_v6 = vld [vmem:[%s1361_s5] sm:$0xff]  ;;  %s880_s15 = sshll.u32 %s423_s12, 3  ;;  %v509_v19 = vld [vmem:[%s1363_s7 + $0x18] sm:$0xff]  ;;  %v508_v26 = vld [vmem:[%s1363_s7 + $0x10] sm:$0xff]  ;;  %p983_p0 = scmp.lt.s32.totalorder %s977_s16, %s1366_s10 }
  0x1d   : > { %499 = vmatpush.msra.mxu1 %v477_v1  ;;  %v437_v7 = vld [vmem:[%s1359_s3] sm:$0xff]  ;;  %s433_s25 = scalar_lea.vmem %s1379_s2, %s880_s15  ;;  %s425_s30 = scalar_lea.vmem %s1380_s0, %s880_s15  ;;  %526 = vmatpush.msra.mxu2 %v509_v19  ;;  %v507_v27 = vld [vmem:[%s1363_s7 + $0x8] sm:$0xff] }
  0x1e   : > { %465 = vmatpush.msra.mxu0 %v439_v3  ;;  %v1230_v8 = vld [vmem:[%s433_s25] sm:$0xff]  ;;  %s429_s12 = scalar_lea.vmem %s1381_s1, %s880_s15  ;;  %s1371_s15 = scalar_lea.vmem [#allocation2], %s1269_s24 }
  0x1f   : > { %500 = vmatpush.msra.mxu1 %v476_v4  ;;  %v435_v9 = vld [vmem:[%s425_s30] sm:$0xff]  ;;  %527 = vmatpush.msra.mxu2 %v508_v26  ;;  %s414_s25 = scalar_lea.vmem [#allocation4], %s1269_s24  ;;  %s982_s2 = scalar_lea.hbm %s1366_s10, 16 }
  0x20   : > { %466 = vmatpush.msra.mxu0 %v438_v5  ;;  %v436_v10 = vld [vmem:[%s429_s12] sm:$0xff]  ;;  %s710_s12 = sshll.u32 %s414_s25, 4  ;;  %s711_s12 = int_to_ptr.vmem [resolvable:$true] %s710_s12 }
  0x21   : > { %501 = vmatpush.msra.mxu1 %v475_v6  ;;  %v951_v11 = vld [vmem:[%s1362_s6] ss:$0 sm:$0xff]  ;;  %528 = vmatpush.msra.mxu2 %v507_v27 }
  0x22   : > { %467 = vmatpush.msra.mxu0 %v437_v7  ;;  %885 = vmatmul.msk.f32.vlgmr.msra.gmra.mxu1 %vm445_vm0, %v1230_v8  ;;  %v952_v12 = vld [vmem:[%s1360_s4] ss:$0 sm:$0xff] }
  0x23   : > { %883 = vmatmul.msk.f32.vlgmr.msra.gmra.mxu0 %vm445_vm0, %v435_v9  ;;  %v506_v28 = vld [vmem:[%s1363_s7] sm:$0xff] }
  0x24   : > { %529 = vmatpush.msra.mxu2 %v506_v28  ;;  %v953_v39 = vld [vmem:[%s1364_s8] ss:$0 sm:$0xff] }
  0x25   : > { %886 = vmatmul.msk.f32.vlgmr.msra.gmra.mxu2 %vm445_vm0, %v1230_v8 }
  0x2b   : > { %884 = vmatmul.msk.f32.gmra.mxu0 %vm445_vm0, %v436_v10 }
  0x9f   : > { %v503_v13 = vpop.f32.mrf.mxu1 }
  0xa0   : > { %v469_v14 = vpop.f32.mrf.mxu0  ;;  %v504_v15 = vadd.f32 %v951_v11, %v503_v13 }
  0xa1   : > { %v470_v16 = vadd.f32 %v952_v12, %v469_v14 }
  0xa2   : > { %887 = vmatpush.xpose.msk.msra.mxu3 %vm534_vm1, %v504_v15 }
  0xa5   : > { %888 = vmatmul.msk.f32.vlgmr.msra.gmra.mxu3 %vm534_vm1, %v470_v16 }
  0xa6   : > { %889 = vmatpush.xpose.msk.msrb.mxu3 %vm534_vm1, %v504_v15 }
  0xa8   : > { %v472_v17 = vpop.f32.mrf.mxu0  ;;  %v531_v40 = vpop.f32.mrf.mxu2 }
  0xa9   : > { %v473_v18 = vadd.f32 %v952_v12, %v472_v17  ;;  %v532_v41 = vadd.f32 %v953_v39, %v531_v40 }
  0xab   : > { %655 = vmatpush.msrb.mxu1 %v532_v41 }
  0xad   : > { %890 = vmatmul.msk.f32.vlgmr.msrb.gmra.mxu3 %vm534_vm1, %v473_v18 }
 0x128   : > { %v558_v20 = vpop.f32.mrf.mxu3 }
 0x129   : > { %v561_v21 = vmul.f32 0.25, %v558_v20 }
 0x12b   : > { %v563_v22 = vsel %vm562_vm2, %v561_v21, -inf }
 0x12c   : > { %564 = vmax.xlane.f32.xlu0 %v563_v22 }
 0x130   : > { %v607_v23 = vpop.f32.mrf.mxu3 }
 0x131   : > { %v610_v24 = vmul.f32 0.25, %v607_v23 }
 0x133   : > { %v611_v25 = vsel %vm562_vm2, %v610_v24, -inf }
 0x134   : > { %612 = vmax.xlane.f32.xlu1 %v611_v25 }
 0x19f   : > { %v565_v29 = vpop.xlane.xlu0 %564 }
 0x1a0   : > { %v566_v30 = vsub.f32 %v561_v21, %v565_v29 }
 0x1a2   : > { %v567_v31 = vmul.f32 1.442695, %v566_v30 }
 0x1a4   : > { %954 = vpow2.f32 %v567_v31 }
 0x1a7   : > { %v613_v32 = vpop.xlane.xlu1 %612 }
 0x1a8   : > { %v614_v33 = vsub.f32 %v610_v24, %v613_v32 }
 0x1aa   : > { %v955_v34 = vpop.eup %954  ;;  %v615_v35 = vmul.f32 1.442695, %v614_v33 }
 0x1ab   : > { %v569_v36 = vsel %vm562_vm2, %v955_v34, 0.0 }
 0x1ac   : > { %956 = vpow2.f32 %v615_v35  ;;  %570 = vadd.xlane.f32.xlu0 %v569_v36 }
 0x1b2   : > { %v957_v37 = vpop.eup %956 }
 0x1b3   : > { %v617_v38 = vsel %vm562_vm2, %v957_v37, 0.0 }
 0x1b4   : > { %618 = vadd.xlane.f32.xlu1 %v617_v38 }
 0x21f   : > { %v571_v42 = vpop.xlane.xlu0 %570 }
 0x220   : > { %958 = vrcp.f32 %v571_v42  ;;  %v583_v47 = vand.u32 2147483648, %v571_v42  ;;  %v581_v49 = vand.u32 2147483647, %v571_v42  ;;  %vm577_vm4 = vweird.f32 %v571_v42 }
 0x222   : > { %v584_v52 = vor.u32 1.1754944e-38, %v583_v47  ;;  %vm582_vm6 = vcmp.eq.f32.partialorder %v581_v49, 8.507059e+37 }
 0x226   : > { %v959_v43 = vpop.eup %958 }
 0x227   : > { %v573_v44 = vmul.f32 %v959_v43, %v571_v42  ;;  %v619_v45 = vpop.xlane.xlu1 %618  ;;  %vm578_vm3 = vweird.f32 %v959_v43 }
 0x228   : > { %960 = vrcp.f32 %v619_v45  ;;  %vm579_vm5 = vmor %vm577_vm4, %vm578_vm3  ;;  %vm625_vm7 = vweird.f32 %v619_v45  ;;  %v631_v55 = vand.u32 2147483648, %v619_v45  ;;  %v629_v58 = vand.u32 2147483647, %v619_v45 }
 0x229   : > { %v574_v46 = vsub.f32 1.0, %v573_v44 }
 0x22a   : > { %v632_v61 = vor.u32 1.1754944e-38, %v631_v55  ;;  %vm630_vm10 = vcmp.eq.f32.partialorder %v629_v58, 8.507059e+37 }
 0x22b   : > { %v575_v48 = vmul.f32 %v959_v43, %v574_v46 }
 0x22d   : > { %v576_v50 = vadd.f32 %v959_v43, %v575_v48 }
 0x22e   : > { %v961_v51 = vpop.eup %960 }
 0x22f   : > { %v580_v53 = vsel %vm579_vm5, %v959_v43, %v576_v50  ;;  %v621_v54 = vmul.f32 %v961_v51, %v619_v45  ;;  %vm626_vm8 = vweird.f32 %v961_v51 }
 0x230   : > { %v585_v56 = vsel %vm582_vm6, %v584_v52, %v580_v53  ;;  %vm627_vm9 = vmor %vm625_vm7, %vm626_vm8 }
 0x231   : > { %v622_v57 = vsub.f32 1.0, %v621_v54  ;;  %v586_v59 = vmul.f32 %v955_v34, %v585_v56 }
 0x233   : > { %v623_v60 = vmul.f32 %v961_v51, %v622_v57  ;;  %891 = vmatmul.msk.f32.vlgmr.msrb.gmra.mxu1 %vm562_vm2, %v586_v59  ;;  %635 = vst.msk [vmem:[%s1371_s15] sm:$0xff] %vm562_vm2, %v586_v59  ;;  %s978_s15 = scalar_lea.hbm %s977_s16, 8 }
 0x234   : > { %p979_p11 = scmp.ne.s32.totalorder %s977_s16, %s978_s15  ;;  %p984_p1 = scmp.lt.s32.totalorder %s982_s2, %s978_s15 }
 0x235   : > { %v624_v62 = vadd.f32 %v961_v51, %v623_v60 }
 0x236   : > { %p980_p12 = pnand %p979_p11, %p1188_p5  ;;  %p985_p2 = por %p984_p1, %p983_p0 }
 0x237   : > { %v628_v63 = vsel %vm627_vm9, %v961_v51, %v624_v62 }
 0x238   : > { %v633_v0 = vsel %vm630_vm10, %v632_v61, %v628_v63  ;;  %p981_p13 = pneg %p980_p12 }
 0x239   : > { %v634_v1 = vmul.f32 %v957_v37, %v633_v0 }
 0x23a   : > { %p986_p3 = pnand %p985_p2, %p981_p13 }
 0x23b   : > { %636 = vst.msk [vmem:[%s414_s25] sm:$0xff] %vm562_vm2, %v634_v1 }
 0x23c   : > { %989 = shalt.err (!%p986_p3)
}
 0x23d   : > { %901 = dma.vmem_to_hbm [thread:$0]  (%p1188_p5), %s711_s12, 128, %s713_s13, %s1286_s14  }
 0x23e   : > { %s694_s0 = scalar_lea.hbm %s1365_s9, %s1279_s22  ;;  %s1382_s1 = scalar_lea.vmem [#allocation2], %s1269_s24 }
 0x23f   : > { %s696_s19 = sshll.u32 %s1382_s1, 4  ;;  %s698_s16 = sshll.u32 %s694_s0, 4  ;;  %s697_s19 = int_to_ptr.vmem [resolvable:$true] %s696_s19  ;;  %s699_s16 = int_to_ptr.hbm [resolvable:$true] %s698_s16 }
 0x240   : > { %s1383_s2 = sand.u32 1, %s1076_s18   ;;  %s1004_s26 = sshra.s32 %s699_s16, 4  ;;  %s1005_s26 = int_to_ptr.hbm [resolvable:$true] %s1004_s26 }
 0x241   : > { %s674_s15 = scalar_lea.sflag [#allocation3], %s1383_s2  ;;  %s1006_s29 = scalar_lea.hbm %s1005_s26, 8 }
 0x242   : > { %p1007_p4 = scmp.ne.s32.totalorder %s1005_s26, %s1006_s29  ;;  %s1010_s13 = scalar_lea.hbm %s1365_s9, 16 }
 0x243   : > { %p1011_p9 = scmp.lt.s32.totalorder %s1005_s26, %s1365_s9  ;;  %p1012_p10 = scmp.lt.s32.totalorder %s1010_s13, %s1006_s29 }
 0x244   : > { %p1008_p7 = pnand %p1007_p4, %p1188_p5 }
 0x245   : > { %p1013_p11 = por %p1012_p10, %p1011_p9 }
 0x246   : > { %p1009_p8 = pneg %p1008_p7 }
 0x248   : > { %p1014_p12 = pnand %p1013_p11, %p1009_p8 }
 0x24a   : > { %1017 = shalt.err (!%p1014_p12)
}
 0x24b   : > { %900 = dma.vmem_to_hbm [thread:$0]  (%p1188_p5), %s697_s19, 128, %s699_s16, %s674_s15   ;;  %vm669_vm11 = vcmask 523264   ;;  %vm671_vm12 = vcmask 785408  }
 0x24c   : > { %s1086_s0 = smov 32   ;;  %s1087_s1 = smov 64  }
 0x24d   : > { %s722_s29 = scalar_lea.hbm %s1367_s11, %s1279_s22  ;;  %s421_s30 = scalar_lea.vmem [#allocation6], %s1269_s24 }
 0x24e   : > { %s724_s12 = sshll.u32 %s421_s30, 4  ;;  %s726_s13 = sshll.u32 %s722_s29, 4  ;;  %s725_s12 = int_to_ptr.vmem [resolvable:$true] %s724_s12  ;;  %s727_s13 = int_to_ptr.hbm [resolvable:$true] %s726_s13 }
 0x24f   : > { %s1032_s19 = sshra.s32 %s727_s13, 4  ;;  %s1038_s15 = scalar_lea.hbm %s1367_s11, 16  ;;  %s1033_s19 = int_to_ptr.hbm [resolvable:$true] %s1032_s19 }
 0x250   : > { %s1034_s16 = scalar_lea.hbm %s1033_s19, 8  ;;  %p1039_p2 = scmp.lt.s32.totalorder %s1033_s19, %s1367_s11 }
 0x251   : > { %p1035_p13 = scmp.ne.s32.totalorder %s1033_s19, %s1034_s16  ;;  %p1040_p3 = scmp.lt.s32.totalorder %s1038_s15, %s1034_s16 }
 0x253   : > { %p1036_p0 = pnand %p1035_p13, %p1188_p5  ;;  %p1041_p4 = por %p1040_p3, %p1039_p2 }
 0x255   : > { %p1037_p1 = pneg %p1036_p0 }
 0x257   : > { %p1042_p7 = pnand %p1041_p4, %p1037_p1 }
 0x2b0   : > { %v657_v2 = vpop.f32.mrf.mxu1 }
 0x2b1   : > { %v658_v3 = vadd.f32 %v657_v2, %v1230_v8 }
 0x2b3   : > { %v660_v4 = vadd.f32 %v658_v3, %v1230_v8 }
 0x2b5   : > { %662 = vrot.lane.b32.xlu2 %v660_v4, %s1086_s0 }
 0x2bd   : > { %665 = vrot.lane.b32.xlu2 %v1230_v8, %s1087_s1 }
 0x30f   : > { %v663_v5 = vpop.permute.xlu2 %662 }
 0x310   : > { %v668_v6 = vsel %vm445_vm0, %v658_v3, %v663_v5 }
 0x317   : > { %v666_v7 = vpop.permute.xlu2 %665 }
 0x318   : > { %v670_v9 = vsel %vm669_vm11, %v668_v6, %v666_v7 }
 0x319   : > { %672 = vst.msk [vmem:[%s421_s30] sm:$0xff] %vm671_vm12, %v670_v9 }
 0x31a   : > { %1045 = shalt.err (!%p1042_p7)
}
 0x31b   : > { %902 = dma.vmem_to_hbm [thread:$0]  (%p1188_p5), %s725_s12, 128, %s727_s13, %s1286_s14  }
 0x31c PF: > { %p916_p8 = scmp.ge.s32.totalorder %s1084_s20, 2  ;;  %s738_s0 = sand.u32 1, %s1072_s17  }
 0x31d   : > { %s739_s1 = scalar_lea.sflag [#allocation3], %s738_s0 }
 0x31e   : > { %p907_p9 = pnand %p916_p8, %p1192_p6 }
 0x320   : > { %p908_p10 = pneg %p907_p9 }
 0x322   : > { %1063 = dma.done.wait (%p908_p10), %s739_s1, 128  }
 0x323   : > { %1065 = vsyncadd (%p908_p10), %s739_s1, 4294967168  ;;  %s1384_s2 = sadd.s32 4294967294, %s1084_s20  }
 0x324   : > { %s748_s26 = sand.u32 1, %s1384_s2  }
 0x325   : > { %s749_s29 = scalar_lea.sflag [#allocation5], %s748_s26 }
 0x326   : > { %1067 = dma.done.wait (%p908_p10), %s749_s29, 256  }
 0x327   : > { %1069 = vsyncadd (%p908_p10), %s749_s29, 4294967040  ;;  %s1385_s27 = sld [smem:[#allocation9_spill]]  ;;  %p25_p5 = scmp.ge.s32.totalorder %s1173_s23, 4  }
 0x328   : > { %s1386_s19 = sld [smem:[#allocation10_spill]]  ;;  %s1387_s17 = smov %s1076_s18 }
 0x329   : > { %s1389_s20 = smov %s1173_s23  ;;  %27 = sbr.rel (!%p25_p5) target bundleno = 9 (0x9), region = 129 }
 0x32d   : > { %s1388_s18 = smov %s1385_s27 }
 0x32e   :  { %765 = vsyncpa [#allocation3], 1 }
 0x32f   :  { %767 = vsyncpa [#allocation3 + $0x1], 1 }
 0x330   :  { %768 = vsyncpa [#allocation5], 1 }
 0x331   :  { %770 = vsyncpa [#allocation5 + $0x1], 1 }

</bundles_post_ra>
